<compile_context>
chip_gen: v7x
topology: tpu7x:2x2x1
jax: 0.10.0
libtpu: 0.0.40
codegen_flags: <defaults>
</compile_context>

<pallas_src>
import math

import jax
import jax.numpy as jnp
from jax import lax
from jax.experimental import pallas as pl
from jax.experimental.pallas import tpu as pltpu


def _round_up(x: int, n: int) -> int:
    return ((x + n - 1) // n) * n


def _make_aamc_kernel(s: float, m: float):
    cos_m = math.cos(m)
    sin_m = math.sin(m)

    def aamc_kernel(lab_ref, x_ref, w_ref, out_ref, cos_ref):
        # cosine = xn @ wn^T, contraction over the shared feature (lane) dim.
        # bf16 operands, f32 accumulation on the MXU; no materialized transpose.
        cosine = lax.dot_general(
            x_ref[...],                       # [TB, Dp] bf16
            w_ref[...],                       # [TC, Dp] bf16
            dimension_numbers=(((1,), (1,)), ((), ())),
            preferred_element_type=jnp.float32,
        )                                     # [TB, TC] f32

        # Margin arithmetic in f32 (easy-margin variant, matching the module).
        sine = jnp.sqrt(jnp.clip(1.0 - cosine * cosine, 0.0, 1.0))
        phi = cosine * cos_m - sine * sin_m
        phi = jnp.where(cosine > 0.0, phi, cosine)

        # One-hot select: lane iota + class-tile offset vs. the label column.
        tb, tc = cosine.shape
        class_ids = lax.broadcasted_iota(jnp.int32, (tb, tc), 1) + pl.program_id(1) * tc
        one_hot = class_ids == lab_ref[...]   # [TB, TC] bool (label is [TB, 1])

        out_ref[...] = jnp.where(one_hot, phi, cosine) * s
        cos_ref[...] = cosine

    return aamc_kernel


def aamc_forward(x, weight, label, s=30.0, m=0.5):
    """x: [B, D] f32, weight: [C, D] f32, label: [B] int -> (output [B, C], cosine [B, C])."""
    B, D = x.shape
    C, _ = weight.shape
    eps = 1e-12  # F.normalize default eps

    # Hoisted L2 normalization (done once, in f32).
    xn = x / jnp.maximum(jnp.sqrt(jnp.sum(x * x, axis=1, keepdims=True)), eps)
    wn = weight / jnp.maximum(jnp.sqrt(jnp.sum(weight * weight, axis=1, keepdims=True)), eps)

    # Tile sizes: lane-dense class tiles, 128-aligned feature dim, modest batch tiles.
    D_pad = _round_up(D, 128)
    TB = min(_round_up(B, 8), 256)
    B_pad = _round_up(B, TB)
    TC = min(_round_up(C, 128), 2048)
    C_pad = _round_up(C, TC)

    # Zero-pad (zeros are harmless in the dot product; padded labels = -1 never match).
    xn_p = jnp.zeros((B_pad, D_pad), jnp.bfloat16).at[:B, :D].set(xn.astype(jnp.bfloat16))
    wn_p = jnp.zeros((C_pad, D_pad), jnp.bfloat16).at[:C, :D].set(wn.astype(jnp.bfloat16))
    lab_p = jnp.full((B_pad, 1), -1, jnp.int32).at[:B, 0].set(label.astype(jnp.int32))

    kernel = _make_aamc_kernel(float(s), float(m))
    grid = (B_pad // TB, C_pad // TC)

    out, cosine = pl.pallas_call(
        kernel,
        grid=grid,
        in_specs=[
            pl.BlockSpec((TB, 1), lambda b, c: (b, 0)),        # labels, keyed on b only
            pl.BlockSpec((TB, D_pad), lambda b, c: (b, 0)),    # normalized x tile
            pl.BlockSpec((TC, D_pad), lambda b, c: (c, 0)),    # normalized weight tile (streamed)
        ],
        out_specs=(
            pl.BlockSpec((TB, TC), lambda b, c: (b, c)),
            pl.BlockSpec((TB, TC), lambda b, c: (b, c)),
        ),
        out_shape=(
            jax.ShapeDtypeStruct((B_pad, C_pad), jnp.float32),
            jax.ShapeDtypeStruct((B_pad, C_pad), jnp.float32),
        ),
        compiler_params=pltpu.CompilerParams(
            dimension_semantics=("parallel", "parallel"),
        ),
    )(lab_p, xn_p, wn_p)

    return out[:B, :C], cosine[:B, :C]


def xavier_uniform(key, out_features, in_features):
    # Deterministic stand-in for nn.init.xavier_uniform_.
    bound = math.sqrt(6.0 / (in_features + out_features))
    return jax.random.uniform(
        key, (out_features, in_features), dtype=jnp.float32, minval=-bound, maxval=bound
    )


if __name__ == "__main__":
    key = jax.random.PRNGKey(0)
    k_x, k_w, k_lab = jax.random.split(key, 3)

    B, D, C = 8, 32, 16  # batch, in_features, out_features (num classes)
    s, m = 30.0, 0.5

    x = jax.random.normal(k_x, (B, D), dtype=jnp.float32)
    weight = xavier_uniform(k_w, C, D)
    label = jax.random.randint(k_lab, (B,), 0, C, dtype=jnp.int32)

    output, cosine = aamc_forward(x, weight, label, s=s, m=m)
    jax.block_until_ready((output, cosine))

    # --- References (mirror the PyTorch forward) ---
    xn = x / jnp.maximum(jnp.linalg.norm(x, axis=1, keepdims=True), 1e-12)
    wn = weight / jnp.maximum(jnp.linalg.norm(weight, axis=1, keepdims=True), 1e-12)

    def margin_from_cos(cos_v):
        sin_v = jnp.sqrt(jnp.clip(1.0 - cos_v**2, 0.0, 1.0))
        phi_v = jnp.where(cos_v > 0, cos_v * math.cos(m) - sin_v * math.sin(m), cos_v)
        one_hot = jax.nn.one_hot(label, C, dtype=jnp.float32)
        return (one_hot * phi_v + (1.0 - one_hot) * cos_v) * s

    # Matched-precision reference (bf16 operands, f32 accumulation) -> tight check.
    cos_bf16 = jnp.dot(
        xn.astype(jnp.bfloat16), wn.astype(jnp.bfloat16).T, preferred_element_type=jnp.float32
    )
    out_bf16 = margin_from_cos(cos_bf16)
    # Full-f32 reference -> loose check (bf16 operand rounding only).
    cos_f32 = xn @ wn.T

    assert jnp.allclose(cosine, cos_bf16, atol=1e-4, rtol=1e-4), "cosine vs matched-precision ref"
    assert jnp.allclose(output, out_bf16, atol=1e-2, rtol=1e-4), "output vs matched-precision ref"
    assert jnp.allclose(cosine, cos_f32, atol=5e-2), "cosine vs f32 ref (bf16 tolerance)"

    print("KERNEL_OK")
</pallas_src>

<mosaic_0001>
module attributes {stable_mosaic.version = 11 : i64} {
  func.func @aamc_kernel(%arg0: i32, %arg1: i32, %arg2: memref<8x1xi32, #tpu.memory_space<vmem>>, %arg3: memref<8x128xbf16, #tpu.memory_space<vmem>>, %arg4: memref<128x128xbf16, #tpu.memory_space<vmem>>, %arg5: memref<8x128xf32, #tpu.memory_space<vmem>>, %arg6: memref<8x128xf32, #tpu.memory_space<vmem>>) attributes {dimension_semantics = [#tpu.dimension_semantics<parallel>, #tpu.dimension_semantics<parallel>], iteration_bounds = array<i64: 1, 1>, scalar_prefetch = 0 : i64, scratch_operands = 0 : i64, tpu.core_type = #tpu.core_type<tc>, window_params = [{transform_indices = @transform_0, window_bounds = array<i64: 8, 1>}, {transform_indices = @transform_1, window_bounds = array<i64: 8, 128>}, {transform_indices = @transform_2, window_bounds = array<i64: 128, 128>}, {transform_indices = @transform_3, window_bounds = array<i64: 8, 128>}, {transform_indices = @transform_4, window_bounds = array<i64: 8, 128>}]} {
    %c0 = arith.constant 0 : index
    %c0_0 = arith.constant 0 : index
    %0 = vector.load %arg3[%c0, %c0_0] : memref<8x128xbf16, #tpu.memory_space<vmem>>, vector<8x128xbf16>
    %c0_1 = arith.constant 0 : index
    %c0_2 = arith.constant 0 : index
    %1 = vector.load %arg4[%c0_1, %c0_2] : memref<128x128xbf16, #tpu.memory_space<vmem>>, vector<128x128xbf16>
    %cst = arith.constant dense<0.000000e+00> : vector<8x128xf32>
    %2 = tpu.matmul %0, %1, %cst {dimension_numbers = #tpu.dot_dimension_numbers<[1], [1], [0], [0], [0, 0, 1, 0], [], []>} : vector<8x128xbf16>, vector<128x128xbf16>, vector<8x128xf32> -> vector<8x128xf32>
    %3 = arith.mulf %2, %2 : vector<8x128xf32>
    %cst_3 = arith.constant 1.000000e+00 : f32
    %4 = vector.broadcast %cst_3 : f32 to vector<8x128xf32>
    %5 = arith.subf %4, %3 : vector<8x128xf32>
    %cst_4 = arith.constant 0.000000e+00 : f32
    %cst_5 = arith.constant 1.000000e+00 : f32
    %6 = vector.broadcast %cst_4 : f32 to vector<8x128xf32>
    %7 = arith.maximumf %6, %5 : vector<8x128xf32>
    %8 = vector.broadcast %cst_5 : f32 to vector<8x128xf32>
    %9 = arith.minimumf %8, %7 : vector<8x128xf32>
    %10 = math.sqrt %9 : vector<8x128xf32>
    %cst_6 = arith.constant 0.87758255 : f32
    %11 = vector.broadcast %cst_6 : f32 to vector<8x128xf32>
    %12 = arith.mulf %2, %11 : vector<8x128xf32>
    %cst_7 = arith.constant 0.47942555 : f32
    %13 = vector.broadcast %cst_7 : f32 to vector<8x128xf32>
    %14 = arith.mulf %10, %13 : vector<8x128xf32>
    %15 = arith.subf %12, %14 : vector<8x128xf32>
    %cst_8 = arith.constant 0.000000e+00 : f32
    %16 = vector.broadcast %cst_8 : f32 to vector<8x128xf32>
    %17 = arith.cmpf ogt, %2, %16 : vector<8x128xf32>
    %18 = arith.select %17, %15, %2 : vector<8x128xi1>, vector<8x128xf32>
    %19 = tpu.iota {dimensions = array<i32: 1>} : vector<8x128xi32>
    %c128_i32 = arith.constant 128 : i32
    %20 = arith.muli %arg1, %c128_i32 : i32
    %21 = vector.broadcast %20 : i32 to vector<8x128xi32>
    %22 = arith.addi %19, %21 : vector<8x128xi32>
    %c0_9 = arith.constant 0 : index
    %c0_10 = arith.constant 0 : index
    %23 = vector.load %arg2[%c0_9, %c0_10] : memref<8x1xi32, #tpu.memory_space<vmem>>, vector<8x1xi32>
    %24 = vector.broadcast %23 : vector<8x1xi32> to vector<8x128xi32>
    %25 = arith.cmpi eq, %22, %24 : vector<8x128xi32>
    %26 = arith.select %25, %18, %2 : vector<8x128xi1>, vector<8x128xf32>
    %cst_11 = arith.constant 3.000000e+01 : f32
    %27 = vector.broadcast %cst_11 : f32 to vector<8x128xf32>
    %28 = arith.mulf %26, %27 : vector<8x128xf32>
    %c0_12 = arith.constant 0 : index
    %c0_13 = arith.constant 0 : index
    %29 = vector.load %arg5[%c0_12, %c0_13] : memref<8x128xf32, #tpu.memory_space<vmem>>, vector<8x128xf32>
    tpu.vector_store %arg5[%c0_12, %c0_13], %28 {strides = array<i32>} : memref<8x128xf32, #tpu.memory_space<vmem>>, vector<8x128xf32>,
    %c0_14 = arith.constant 0 : index
    %c0_15 = arith.constant 0 : index
    %30 = vector.load %arg6[%c0_14, %c0_15] : memref<8x128xf32, #tpu.memory_space<vmem>>, vector<8x128xf32>
    tpu.vector_store %arg6[%c0_14, %c0_15], %2 {strides = array<i32>} : memref<8x128xf32, #tpu.memory_space<vmem>>, vector<8x128xf32>,
    return
  }
  func.func @transform_0(%arg0: i32, %arg1: i32) -> (i32, i32) {
    %c0_i32 = arith.constant 0 : i32
    %c0_i32_0 = arith.constant 0 : i32
    return %arg0, %c0_i32 : i32, i32
  }
  func.func @transform_1(%arg0: i32, %arg1: i32) -> (i32, i32) {
    %c0_i32 = arith.constant 0 : i32
    %c0_i32_0 = arith.constant 0 : i32
    return %arg0, %c0_i32 : i32, i32
  }
  func.func @transform_2(%arg0: i32, %arg1: i32) -> (i32, i32) {
    %c0_i32 = arith.constant 0 : i32
    %c0_i32_0 = arith.constant 0 : i32
    return %arg1, %c0_i32 : i32, i32
  }
  func.func @transform_3(%arg0: i32, %arg1: i32) -> (i32, i32) {
    %c0_i32 = arith.constant 0 : i32
    return %arg0, %arg1 : i32, i32
  }
  func.func @transform_4(%arg0: i32, %arg1: i32) -> (i32, i32) {
    %c0_i32 = arith.constant 0 : i32
    return %arg0, %arg1 : i32, i32
  }
}

</mosaic_0001>

<bundles_post_ra>
// kernel: tpu_custom_call.1
= control target key start
LH: loop header
LB: loop body
LE: loop exit
PB: predicated region body
PF: predicated region fallthrough
CT: control target
= control target key end

     0   :  { %10 = vsyncpa [#allocation3], 0  ;;  %s400_s0 = inlined_call_operand.vmem [shape: s32[8,1], index: 0, kind: input, shape index: {}]   ;;  %s401_s1 = inlined_call_operand.vmem [shape: bf16[8,128], index: 1, kind: input, shape index: {}]   ;;  %s402_s2 = inlined_call_operand.hbm [shape: bf16[128,128], index: 2, kind: input, shape index: {}]   ;;  %s403_s3 = inlined_call_operand.hbm [shape: f32[8,128], index: 3, kind: output, shape index: {0}]   ;;  %s404_s4 = inlined_call_operand.hbm [shape: f32[8,128], index: 4, kind: output, shape index: {1}]  }
   0x1   :  { %11 = vsyncpa [#allocation4], 0 }
   0x2   :  { %12 = vsyncpa [#allocation7], 0  ;;  %s325_s15 = smov [#allocation2]   ;;  %s253_s19 = scalar_lea.hbm %s402_s2, 1024 }
   0x3   :  { %s22_s16 = sshll.u32 %s325_s15, 4  ;;  %p254_p0 = scmp.ne.s32.totalorder %s402_s2, %s253_s19  ;;  %s23_s16 = int_to_ptr.vmem [resolvable:$true] %s22_s16 }
   0x4   :  { %p257_p1 = scmp.lt.u32.totalorder %s253_s19, %s402_s2 }
   0x6   :  { %p259_p2 = pnand %p257_p1, %p254_p0 }
   0x8   :  { %262 = shalt.err (!%p259_p2)
}
   0x9   :  { %s263_s24 = scalar_lea.vmem %s23_s16, 1024  ;;  %p268_p4 = scmp.lt.s32.totalorder %s23_s16, %s23_s16 }
   0xa   :  { %p264_p3 = scmp.ne.s32.totalorder %s23_s16, %s263_s24  ;;  %p269_p5 = scmp.lt.s32.totalorder %s263_s24, %s263_s24 }
   0xc   :  { %p270_p6 = por %p269_p5, %p268_p4 }
   0xe   :  { %p271_p7 = pnand %p270_p6, %p264_p3 }
  0x10   :  { %274 = shalt.err (!%p271_p7)
}
  0x11   :  { %s326_s25 = smov 64   ;;  %s327_s26 = smov 4  }
  0x12   :  { %28 = dma.hbm_to_vmem [thread:$0]  %s402_s2, 1024, %s23_s16, [#allocation3], %s326_s25, %s326_s25, %s327_s26  }
  0x13   :  { %319 = dma.done.wait [#allocation3], 1024  }
  0x14   :  { %320 = vsyncadd [#allocation3], 4294966272  ;;  %v328_v0 = vmov 0.0   ;;  %vm329_vm0 = vmmov 0   ;;  %v330_v1 = vmov 0   ;;  %v243_v2 = vld [vmem:[#allocation2] sm:$0xff]  }
  0x15   :  { %214 = vmatprep.subr.bf16.mxu0 %v328_v0  ;;  %230 = vmatprep.mubr.msk.bf16.mxu0 %vm329_vm0, %v328_v0  ;;  %v244_v3 = vld [vmem:[#allocation2 + $0x8] sm:$0xff]   ;;  %v159_v4 = vld [vmem:[%s400_s0] sm:$0xff]  ;;  %v246_v6 = vld [vmem:[#allocation2 + $0x18] sm:$0xff]   ;;  %s331_s5 = smov [#allocation6]  }
  0x16   :  { %242 = vset.pattern.permute.xlu0 %v330_v1  ;;  %215 = vmatpush3.bf16.xpose.msra.mxu0 %v243_v2  ;;  %v245_v5 = vld [vmem:[#allocation2 + $0x10] sm:$0xff]   ;;  %v247_v7 = vld [vmem:[#allocation2 + $0x20] sm:$0xff]   ;;  %v248_v8 = vld [vmem:[#allocation2 + $0x28] sm:$0xff]   ;;  %s184_s6 = sshll.u32 %s331_s5, 4  ;;  %s185_s6 = int_to_ptr.vmem [resolvable:$true] %s184_s6 }
  0x17   :  { %216 = vmatprep.subr.bf16.mxu0 %v328_v0  ;;  %161 = vperm.xlu0 %242, %v159_v4   ;;  %v249_v9 = vld [vmem:[#allocation2 + $0x30] sm:$0xff]   ;;  %v250_v10 = vld [vmem:[#allocation2 + $0x38] sm:$0xff]   ;;  %s275_s7 = scalar_lea.vmem %s185_s6, 128  ;;  %p280_p9 = scmp.lt.s32.totalorder %s185_s6, %s185_s6 }
  0x18   :  { %v33_v11 = vld [vmem:[%s401_s1] sm:$0xf]  ;;  %p276_p8 = scmp.ne.s32.totalorder %s185_s6, %s275_s7  ;;  %p281_p10 = scmp.lt.s32.totalorder %s275_s7, %s275_s7 }
  0x1a   :  { %p282_p11 = por %p281_p10, %p280_p9 }
  0x1c   :  { %p283_p12 = pnand %p282_p11, %p276_p8 }
  0x1e   :  { %217 = vmatpush3.bf16.xpose.msra.mxu0 %v244_v3 }
  0x1f   :  { %218 = vmatprep.subr.bf16.mxu0 %v328_v0 }
  0x26   :  { %219 = vmatpush3.bf16.xpose.msra.mxu0 %v245_v5 }
  0x27   :  { %220 = vmatprep.subr.bf16.mxu0 %v328_v0 }
  0x2e   :  { %221 = vmatpush3.bf16.xpose.msra.mxu0 %v246_v6 }
  0x2f   :  { %222 = vmatprep.subr.bf16.mxu0 %v328_v0 }
  0x36   :  { %223 = vmatpush3.bf16.xpose.msra.mxu0 %v247_v7 }
  0x37   :  { %224 = vmatprep.subr.bf16.mxu0 %v328_v0 }
  0x3e   :  { %225 = vmatpush3.bf16.xpose.msra.mxu0 %v248_v8 }
  0x3f   :  { %226 = vmatprep.subr.bf16.mxu0 %v328_v0 }
  0x46   :  { %227 = vmatpush3.bf16.xpose.msra.mxu0 %v249_v9 }
  0x47   :  { %228 = vmatprep.subr.bf16.mxu0 %v328_v0 }
  0x4e   :  { %229 = vmatpush3.bf16.xpose.msra.mxu0 %v250_v10 }
  0x55   :  { %231 = vmatmul.mubr.bf16.vlgmr.msra.gmra.mrb[0].mxu0 %v33_v11 }
 0x128   :  { %v132_v12 = vpop.f32.mrb[0].mxu0 }
 0x129   :  { %v138_v13 = vmul.f32 %v132_v12, %v132_v12  ;;  %167 = vst [vmem:[#allocation6] sm:$0xff] %v132_v12  ;;  %v232_v14 = vpop.f32.mrb[1].mxu0 }
 0x12a   :  { %v135_v15 = vpop.f32.mrb[2].mxu0 }
 0x12b   :  { %286 = shalt.err (!%p283_p12)
}
 0x12c   :  { %s287_s1 = scalar_lea.hbm %s404_s4, 128 }
 0x12d   :  { %p288_p13 = scmp.ne.s32.totalorder %s404_s4, %s287_s1  ;;  %p291_p0 = scmp.lt.u32.totalorder %s287_s1, %s404_s4 }
 0x12f   :  { %p293_p1 = pnand %p291_p0, %p288_p13 }
 0x131   :  { %296 = shalt.err (!%p293_p1)
}
 0x132   :  { %187 = dma.vmem_to_hbm [thread:$0]  %s185_s6, 128, %s404_s4, [#allocation7]   ;;  %v139_v16 = vsub.f32 1.0, %v138_v13  ;;  %v233_v17 = vpop.f32.mrb[3].mxu0  ;;  %v154_v20 = vlaneseq  ;;  %v162_v26 = vpop.permute.xlu0 %161  ;;  %v149_v28 = vmul.f32 0.87758255, %v132_v12 }
 0x133   :  { %vm152_vm4 = vcmp.gt.f32.partialorder %v132_v12, 0.0  ;;  %s332_s4 = smov [#allocation5]  }
 0x134   :  { %v140_v18 = vmax.f32 %v139_v16, 0.0  ;;  %v155_v24 = vand.u32 127, %v154_v20  ;;  %s174_s16 = sshll.u32 %s332_s4, 4  ;;  %s175_s16 = int_to_ptr.vmem [resolvable:$true] %s174_s16 }
 0x135   :  { %s297_s17 = scalar_lea.vmem %s175_s16, 128  ;;  %p302_p3 = scmp.lt.s32.totalorder %s175_s16, %s175_s16 }
 0x136   :  { %v141_v19 = vmin.f32 %v140_v18, 1.0  ;;  %vm163_vm3 = vcmp.eq.s32.totalorder %v155_v24, %v162_v26  ;;  %p298_p2 = scmp.ne.s32.totalorder %s175_s16, %s297_s17  ;;  %p303_p4 = scmp.lt.s32.totalorder %s297_s17, %s297_s17 }
 0x138   :  { %251 = vrsqrt.f32 %v141_v19  ;;  %vm144_vm1 = vcmp.eq.f32.partialorder %v141_v19, inf  ;;  %v147_v23 = vand.u32 2147483648, %v141_v19  ;;  %vm146_vm2 = vcmp.eq.f32.partialorder %v141_v19, 0.0  ;;  %p304_p5 = por %p303_p4, %p302_p3 }
 0x13a   :  { %p305_p6 = pnand %p304_p5, %p298_p2 }
 0x142   :  { %v252_v21 = vpop.eup %251 }
 0x143   :  { %v143_v22 = vmul.f32 %v252_v21, %v141_v19 }
 0x145   :  { %v145_v25 = vsel %vm144_vm1, %v141_v19, %v143_v22 }
 0x146   :  { %v148_v27 = vsel %vm146_vm2, %v147_v23, %v145_v25 }
 0x147   :  { %v150_v29 = vmul.f32 0.47942555, %v148_v27 }
 0x149   :  { %v151_v30 = vsub.f32 %v149_v28, %v150_v29 }
 0x14b   :  { %v153_v31 = vsel %vm152_vm4, %v151_v30, %v132_v12 }
 0x14c   :  { %v164_v32 = vsel %vm163_vm3, %v153_v31, %v132_v12 }
 0x14d   :  { %v165_v33 = vmul.f32 30.0, %v164_v32 }
 0x14f   :  { %166 = vst [vmem:[#allocation5] sm:$0xff] %v165_v33 }
 0x150   :  { %308 = shalt.err (!%p305_p6)
}
 0x151   :  { %s309_s20 = scalar_lea.hbm %s403_s3, 128 }
 0x152   :  { %p310_p7 = scmp.ne.s32.totalorder %s403_s3, %s309_s20  ;;  %p313_p8 = scmp.lt.u32.totalorder %s309_s20, %s403_s3 }
 0x154   :  { %p315_p9 = pnand %p313_p8, %p310_p7 }
 0x156   :  { %318 = shalt.err (!%p315_p9)
}
 0x157   :  { %177 = dma.vmem_to_hbm [thread:$0]  %s175_s16, 128, %s403_s3, [#allocation4]  }
 0x158   :  { %321 = dma.done.wait [#allocation4], 128  }
 0x159   :  { %322 = vsyncadd [#allocation4], 4294967168 }
 0x15a   :  { %323 = dma.done.wait [#allocation7], 128  }
 0x15b   :  { %324 = vsyncadd [#allocation7], 4294967168 }
 0x15c   :  { %194 = vsyncpa [#allocation3], 1 }
 0x15d   :  { %195 = vsyncpa [#allocation4], 1 }
 0x15e   :  { %196 = vsyncpa [#allocation7], 1 }

</bundles_post_ra>
